<compile_context>
chip_gen: v5e
topology: v5e:2x2
jax: 0.10.0
libtpu: 0.0.40
codegen_flags: <defaults>
</compile_context>

<pallas_src>
import math
from functools import partial

import jax
import jax.numpy as jnp
import numpy as np
from jax.experimental import pallas as pl
from jax.experimental.pallas import tpu as pltpu


def cheb_conv_kernel(*refs, K, fin_p, Bt, has_bias, compute_dtype):
    """One batch-block per grid step.

    refs layout:
      lap_t_ref: [V, V]            transposed Laplacian (compute_dtype)
      x_ref:     [Bt*fin_p, V]     activations, rows (batch, fin), V on lanes
      w_ref:     [K, Fout, fin_p]  per-order effective weights (compute_dtype)
      b_ref:     [Fout, 1]         bias (only present when has_bias)
      out_ref:   [Bt, Fout, V]     output block (NCV layout)
      acc_ref:   [Bt, Fout, V]     f32 accumulator scratch
    """
    lap_t_ref, x_ref, w_ref = refs[:3]
    b_ref = refs[3] if has_bias else None
    out_ref, acc_ref = refs[-2], refs[-1]
    cdt = compute_dtype

    lap_t = lap_t_ref[...]                               # [V, V], loaded once

    def accumulate(k, xk_c):
        """acc[b] (+)= w_k @ x_k[b]; w_k stays stationary across the b loop."""
        w_k = w_ref[k]                                   # [Fout, fin_p]
        for b in range(Bt):                              # Bt is capped small
            xb = xk_c[b * fin_p:(b + 1) * fin_p, :]      # tile-aligned slice
            contrib = jnp.dot(w_k, xb, preferred_element_type=jnp.float32)
            if k == 0:
                acc_ref[b] = contrib                     # init (no zero pass)
            else:
                acc_ref[b] += contrib

    # --- Chebyshev recursion; state f32, MXU fed `compute_dtype` -------------
    x_prev = x_ref[...].astype(jnp.float32)              # x_0 slab
    xk_c = x_prev.astype(cdt)
    accumulate(0, xk_c)
    if K > 1:
        x_cur = jnp.dot(xk_c, lap_t, preferred_element_type=jnp.float32)  # x_1
        xk_c = x_cur.astype(cdt)
        accumulate(1, xk_c)
        for k in range(2, K):
            x_next = 2.0 * jnp.dot(xk_c, lap_t,
                                   preferred_element_type=jnp.float32) - x_prev
            x_prev, x_cur = x_cur, x_next
            xk_c = x_cur.astype(cdt)
            accumulate(k, xk_c)

    # --- epilogue -------------------------------------------------------------
    res = acc_ref[...]                                   # [Bt, Fout, V] f32
    if has_bias:
        res = res + b_ref[...]                           # [Fout, 1] broadcasts
    out_ref[...] = res.astype(out_ref.dtype)


def conv_forward(lap, x, weight, bias=None, *, compute_dtype=jnp.float32,
                 block_batch=None, vmem_budget_frac=0.45):
    """Pallas version of Conv.forward (ChebConv + bias).

    Args:
      lap:    [V, V] dense Laplacian (dense stand-in for torch's sparse L).
      x:      [B, Fin, V] input (PyTorch NCV layout).
      weight: [K, Fin, Fout] ChebConv weight.
      bias:   [Fout] or None.
      compute_dtype: dtype fed to the MXU (f32 default; bf16 halves lap/w
        footprint and runs at native MXU rate on v6e/v7x — validate numerics).
      block_batch: optional explicit batch-block override (testing).
    Returns:
      [B, Fout, V]
    """
    B, Fin, V = x.shape
    K, Fin_w, Fout = weight.shape
    assert Fin_w == Fin and weight.shape == (K, Fin, Fout)

    cdt = jnp.dtype(compute_dtype)
    sub = 16 if cdt == jnp.bfloat16 else 8               # sublane packing tile
    fin_p = ((Fin + sub - 1) // sub) * sub

    # --- effective weight: torch's flat-buffer pairing, bug-compatible --------
    # torch pairs activation column (fin*K + k) with weight.view(Fin*K, Fout)
    # row (fin*K + k).  Reinterpreting the *unpadded* flat [K, Fin, Fout]
    # buffer as [Fin, K, Fout] reproduces exactly that row ordering.  The fin
    # padding MUST be applied after this reshape (padded activation rows and
    # weight columns are zero, so results are unchanged).
    w_pt = weight.reshape(Fin, K, Fout)                   # flat reinterpretation
    w_eff = jnp.transpose(w_pt, (1, 2, 0))                # [K, Fout, Fin]
    if fin_p != Fin:
        w_eff = jnp.pad(w_eff, ((0, 0), (0, 0), (0, fin_p - Fin)))
    w_eff = w_eff.astype(cdt)

    lap_t = jnp.transpose(lap).astype(cdt)                # x @ L^T == (L @ x^T)^T
    has_bias = bias is not None

    out_dtype = x.dtype
    cbytes = cdt.itemsize
    obytes = jnp.dtype(out_dtype).itemsize

    # --- batch blocking from an explicit VMEM budget ---------------------------
    try:
        vmem_cap = int(pltpu.get_tpu_info().vmem_capacity_bytes)
    except Exception:
        vmem_cap = 64 * 1024 * 1024                       # conservative (v7x TC)
    budget = int(vmem_budget_frac * vmem_cap)

    fixed = (2 * V * V * cbytes                           # lap (double-buffered)
             + 2 * K * Fout * fin_p * cbytes              # weights
             + 2 * Fout * 4)                              # bias
    per_b = (2 * fin_p * V * 4                            # x block (dbl-buffered)
             + 3 * fin_p * V * 4                          # live recursion slabs
             + 2 * Fout * V * obytes                      # out block (dbl-buffered)
             + Fout * V * 4)                              # f32 accumulator
    bt_cap = int(min(32, max(8, 128 // fin_p)))           # bound in-kernel unroll
    Bt = int(max(1, min(B, bt_cap, (budget - fixed) // per_b)))
    # Megacore: keep >= 2 batch blocks so both v7x TensorCores get work
    # (costs only one extra ~0.35us grid step on single-TC v5e/v6e).
    if B >= 2 and Bt >= B:
        Bt = (B + 1) // 2
    if block_batch is not None:
        Bt = max(1, min(B, int(block_batch)))
    Bp = ((B + Bt - 1) // Bt) * Bt

    x_p = x
    if Bp != B or fin_p != Fin:
        x_p = jnp.pad(x, ((0, Bp - B), (0, fin_p - Fin), (0, 0)))
    x2d = x_p.reshape(Bp * fin_p, V).astype(jnp.float32)  # contiguous reshape

    args = [lap_t, x2d, w_eff]
    in_specs = [
        pl.BlockSpec((V, V), lambda i: (0, 0)),               # grid-invariant
        pl.BlockSpec((Bt * fin_p, V), lambda i: (i, 0)),       # batch block
        pl.BlockSpec((K, Fout, fin_p), lambda i: (0, 0, 0)),   # grid-invariant
    ]
    if has_bias:
        args.append(bias.reshape(Fout, 1).astype(jnp.float32))
        in_specs.append(pl.BlockSpec((Fout, 1), lambda i: (0, 0)))

    kernel = partial(cheb_conv_kernel, K=K, fin_p=fin_p, Bt=Bt,
                     has_bias=has_bias, compute_dtype=cdt)
    vmem_limit = int(min(0.9 * vmem_cap, 128 * 1024 * 1024))

    out = pl.pallas_call(
        kernel,
        out_shape=jax.ShapeDtypeStruct((Bp, Fout, V), out_dtype),
        grid=(Bp // Bt,),
        in_specs=in_specs,
        out_specs=pl.BlockSpec((Bt, Fout, V), lambda i: (i, 0, 0)),
        scratch_shapes=[pltpu.VMEM((Bt, Fout, V), jnp.float32)],
        compiler_params=pltpu.CompilerParams(
            dimension_semantics=("parallel",),
            vmem_limit_bytes=vmem_limit),
    )(*args)

    return out[:B] if Bp != B else out


def conv_reference(lap, x, weight, bias):
    """Pure-jnp mirror of the PyTorch cheb_conv (correctness oracle, full f32)."""
    B, Fin, V = x.shape
    K, _, Fout = weight.shape
    with jax.default_matmul_precision("highest"):
        x0 = jnp.transpose(x, (2, 1, 0)).reshape(V, Fin * B)
        xs = [x0]
        if K > 1:
            x1 = lap @ x0
            xs.append(x1)
            for _ in range(2, K):
                x2 = 2.0 * (lap @ x1) - x0
                xs.append(x2)
                x0, x1 = x1, x2
        inp = jnp.stack(xs, 0).reshape(K, V, Fin, B)
        inp = jnp.transpose(inp, (3, 1, 2, 0)).reshape(B * V, Fin * K)
        out = (inp @ weight.reshape(Fin * K, Fout)).reshape(B, V, Fout)
        out = jnp.transpose(out, (0, 2, 1))
        if bias is not None:
            out = out + bias[None, :, None]
    return out


def _run_case(key, B, Fin, Fout, V, K, with_bias, rtol=2e-4, atol=2e-5,
              **fwd_kwargs):
    k_lap, k_x, k_w = jax.random.split(key, 3)
    A = jax.random.normal(k_lap, (V, V), dtype=jnp.float32)
    lap = 0.5 * (A + A.T) / float(V)          # dense symmetric stand-in for sparse L
    x = jax.random.normal(k_x, (B, Fin, V), dtype=jnp.float32)
    std = math.sqrt(2.0 / (Fin * K))          # ChebConv.kaiming_initialization
    weight = std * jax.random.normal(k_w, (K, Fin, Fout), dtype=jnp.float32)
    bias = jnp.full((Fout,), 0.01, dtype=jnp.float32) if with_bias else None

    out = jax.block_until_ready(conv_forward(lap, x, weight, bias, **fwd_kwargs))
    ref = jax.block_until_ready(conv_reference(lap, x, weight, bias))

    assert out.shape == (B, Fout, V), out.shape
    np.testing.assert_allclose(np.asarray(out), np.asarray(ref),
                               rtol=rtol, atol=atol)


if __name__ == "__main__":
    root = jax.random.PRNGKey(0)
    k0, k1, k2 = jax.random.split(root, 3)

    # Small shapes matching the module's tiny building block (f32 path).
    _run_case(k0, B=2, Fin=4, Fout=8, V=16, K=3, with_bias=True)

    # Lane-dense V, multi-block batch grid with padding (B=5 -> 6, grid=3),
    # no bias (bias-free kernel variant), forced small batch block.
    _run_case(k1, B=5, Fin=4, Fout=8, V=128, K=4, with_bias=False,
              block_batch=2)

    # bf16 MXU-feed path (recursion state / accumulation stay f32); looser
    # tolerances account for bf16 operand rounding.
    _run_case(k2, B=3, Fin=8, Fout=16, V=256, K=3, with_bias=True,
              compute_dtype=jnp.bfloat16, rtol=5e-2, atol=5e-2)

    print("KERNEL_OK")
</pallas_src>

<mosaic_0001>
module attributes {stable_mosaic.version = 11 : i64} {
  func.func @cheb_conv_kernel(%arg0: i32, %arg1: memref<16x16xf32, #tpu.memory_space<vmem>>, %arg2: memref<8x16xf32, #tpu.memory_space<vmem>>, %arg3: memref<3x8x8xf32, #tpu.memory_space<vmem>>, %arg4: memref<8x1xf32, #tpu.memory_space<vmem>>, %arg5: memref<1x8x16xf32, #tpu.memory_space<vmem>>, %arg6: memref<1x8x16xf32, #tpu.memory_space<vmem>>) attributes {dimension_semantics = [#tpu.dimension_semantics<parallel>], iteration_bounds = array<i64: 2>, scalar_prefetch = 0 : i64, scratch_operands = 1 : i64, tpu.core_type = #tpu.core_type<tc>, window_params = [{pipeline_mode = #tpu.pipeline_mode<synchronous>, transform_indices = @transform_0, window_bounds = array<i64: 16, 16>}, {transform_indices = @transform_1, window_bounds = array<i64: 8, 16>}, {pipeline_mode = #tpu.pipeline_mode<synchronous>, transform_indices = @transform_2, window_bounds = array<i64: 3, 8, 8>}, {pipeline_mode = #tpu.pipeline_mode<synchronous>, transform_indices = @transform_3, window_bounds = array<i64: 8, 1>}, {transform_indices = @transform_4, window_bounds = array<i64: 1, 8, 16>}]} {
    %c0 = arith.constant 0 : index
    %c0_0 = arith.constant 0 : index
    %0 = vector.load %arg1[%c0, %c0_0] : memref<16x16xf32, #tpu.memory_space<vmem>>, vector<16x16xf32>
    %c0_1 = arith.constant 0 : index
    %c0_2 = arith.constant 0 : index
    %1 = vector.load %arg2[%c0_1, %c0_2] : memref<8x16xf32, #tpu.memory_space<vmem>>, vector<8x16xf32>
    %c0_3 = arith.constant 0 : index
    %c0_4 = arith.constant 0 : index
    %c0_5 = arith.constant 0 : index
    %2 = vector.load %arg3[%c0_3, %c0_4, %c0_5] : memref<3x8x8xf32, #tpu.memory_space<vmem>>, vector<1x8x8xf32>
    %3 = vector.shape_cast %2 : vector<1x8x8xf32> to vector<8x8xf32>
    %cst = arith.constant dense<0.000000e+00> : vector<8x16xf32>
    %4 = tpu.matmul %3, %1, %cst {dimension_numbers = #tpu.dot_dimension_numbers<[1], [0], [0], [1], [0, 0, 1, 1], [], []>} : vector<8x8xf32>, vector<8x16xf32>, vector<8x16xf32> -> vector<8x16xf32>
    %c0_6 = arith.constant 0 : index
    %c0_7 = arith.constant 0 : index
    %c0_8 = arith.constant 0 : index
    %5 = vector.load %arg6[%c0_6, %c0_7, %c0_8] : memref<1x8x16xf32, #tpu.memory_space<vmem>>, vector<1x8x16xf32>
    %6 = vector.shape_cast %5 : vector<1x8x16xf32> to vector<8x16xf32>
    %7 = vector.shape_cast %4 : vector<8x16xf32> to vector<1x8x16xf32>
    tpu.vector_store %arg6[%c0_6, %c0_7, %c0_8], %7 {strides = array<i32>} : memref<1x8x16xf32, #tpu.memory_space<vmem>>, vector<1x8x16xf32>,
    %cst_9 = arith.constant dense<0.000000e+00> : vector<8x16xf32>
    %8 = tpu.matmul %1, %0, %cst_9 {dimension_numbers = #tpu.dot_dimension_numbers<[1], [0], [0], [1], [0, 0, 1, 1], [], []>} : vector<8x16xf32>, vector<16x16xf32>, vector<8x16xf32> -> vector<8x16xf32>
    %c1 = arith.constant 1 : index
    %c0_10 = arith.constant 0 : index
    %c0_11 = arith.constant 0 : index
    %9 = vector.load %arg3[%c1, %c0_10, %c0_11] : memref<3x8x8xf32, #tpu.memory_space<vmem>>, vector<1x8x8xf32>
    %10 = vector.shape_cast %9 : vector<1x8x8xf32> to vector<8x8xf32>
    %cst_12 = arith.constant dense<0.000000e+00> : vector<8x16xf32>
    %11 = tpu.matmul %10, %8, %cst_12 {dimension_numbers = #tpu.dot_dimension_numbers<[1], [0], [0], [1], [0, 0, 1, 1], [], []>} : vector<8x8xf32>, vector<8x16xf32>, vector<8x16xf32> -> vector<8x16xf32>
    %c0_13 = arith.constant 0 : index
    %c0_14 = arith.constant 0 : index
    %c0_15 = arith.constant 0 : index
    %12 = vector.load %arg6[%c0_13, %c0_14, %c0_15] : memref<1x8x16xf32, #tpu.memory_space<vmem>>, vector<1x8x16xf32>
    %13 = vector.shape_cast %12 : vector<1x8x16xf32> to vector<8x16xf32>
    %14 = arith.addf %13, %11 : vector<8x16xf32>
    %c0_16 = arith.constant 0 : index
    %c0_17 = arith.constant 0 : index
    %c0_18 = arith.constant 0 : index
    %15 = vector.load %arg6[%c0_16, %c0_17, %c0_18] : memref<1x8x16xf32, #tpu.memory_space<vmem>>, vector<1x8x16xf32>
    %16 = vector.shape_cast %15 : vector<1x8x16xf32> to vector<8x16xf32>
    %17 = vector.shape_cast %14 : vector<8x16xf32> to vector<1x8x16xf32>
    tpu.vector_store %arg6[%c0_16, %c0_17, %c0_18], %17 {strides = array<i32>} : memref<1x8x16xf32, #tpu.memory_space<vmem>>, vector<1x8x16xf32>,
    %cst_19 = arith.constant dense<0.000000e+00> : vector<8x16xf32>
    %18 = tpu.matmul %8, %0, %cst_19 {dimension_numbers = #tpu.dot_dimension_numbers<[1], [0], [0], [1], [0, 0, 1, 1], [], []>} : vector<8x16xf32>, vector<16x16xf32>, vector<8x16xf32> -> vector<8x16xf32>
    %cst_20 = arith.constant 2.000000e+00 : f32
    %19 = vector.broadcast %cst_20 : f32 to vector<8x16xf32>
    %20 = arith.mulf %19, %18 : vector<8x16xf32>
    %21 = arith.subf %20, %1 : vector<8x16xf32>
    %c2 = arith.constant 2 : index
    %c0_21 = arith.constant 0 : index
    %c0_22 = arith.constant 0 : index
    %22 = vector.load %arg3[%c2, %c0_21, %c0_22] : memref<3x8x8xf32, #tpu.memory_space<vmem>>, vector<1x8x8xf32>
    %23 = vector.shape_cast %22 : vector<1x8x8xf32> to vector<8x8xf32>
    %cst_23 = arith.constant dense<0.000000e+00> : vector<8x16xf32>
    %24 = tpu.matmul %23, %21, %cst_23 {dimension_numbers = #tpu.dot_dimension_numbers<[1], [0], [0], [1], [0, 0, 1, 1], [], []>} : vector<8x8xf32>, vector<8x16xf32>, vector<8x16xf32> -> vector<8x16xf32>
    %c0_24 = arith.constant 0 : index
    %c0_25 = arith.constant 0 : index
    %c0_26 = arith.constant 0 : index
    %25 = vector.load %arg6[%c0_24, %c0_25, %c0_26] : memref<1x8x16xf32, #tpu.memory_space<vmem>>, vector<1x8x16xf32>
    %26 = vector.shape_cast %25 : vector<1x8x16xf32> to vector<8x16xf32>
    %27 = arith.addf %26, %24 : vector<8x16xf32>
    %c0_27 = arith.constant 0 : index
    %c0_28 = arith.constant 0 : index
    %c0_29 = arith.constant 0 : index
    %28 = vector.load %arg6[%c0_27, %c0_28, %c0_29] : memref<1x8x16xf32, #tpu.memory_space<vmem>>, vector<1x8x16xf32>
    %29 = vector.shape_cast %28 : vector<1x8x16xf32> to vector<8x16xf32>
    %30 = vector.shape_cast %27 : vector<8x16xf32> to vector<1x8x16xf32>
    tpu.vector_store %arg6[%c0_27, %c0_28, %c0_29], %30 {strides = array<i32>} : memref<1x8x16xf32, #tpu.memory_space<vmem>>, vector<1x8x16xf32>,
    %c0_30 = arith.constant 0 : index
    %c0_31 = arith.constant 0 : index
    %c0_32 = arith.constant 0 : index
    %31 = vector.load %arg6[%c0_30, %c0_31, %c0_32] : memref<1x8x16xf32, #tpu.memory_space<vmem>>, vector<1x8x16xf32>
    %c0_33 = arith.constant 0 : index
    %c0_34 = arith.constant 0 : index
    %32 = vector.load %arg4[%c0_33, %c0_34] : memref<8x1xf32, #tpu.memory_space<vmem>>, vector<8x1xf32>
    %33 = vector.shape_cast %32 : vector<8x1xf32> to vector<1x8x1xf32>
    %34 = vector.broadcast %33 : vector<1x8x1xf32> to vector<1x8x16xf32>
    %35 = arith.addf %31, %34 : vector<1x8x16xf32>
    %c0_35 = arith.constant 0 : index
    %c0_36 = arith.constant 0 : index
    %c0_37 = arith.constant 0 : index
    %36 = vector.load %arg5[%c0_35, %c0_36, %c0_37] : memref<1x8x16xf32, #tpu.memory_space<vmem>>, vector<1x8x16xf32>
    tpu.vector_store %arg5[%c0_35, %c0_36, %c0_37], %35 {strides = array<i32>} : memref<1x8x16xf32, #tpu.memory_space<vmem>>, vector<1x8x16xf32>,
    return
  }
  func.func @transform_0(%arg0: i32) -> (i32, i32) {
    %c0_i32 = arith.constant 0 : i32
    %c0_i32_0 = arith.constant 0 : i32
    %c0_i32_1 = arith.constant 0 : i32
    return %c0_i32, %c0_i32_0 : i32, i32
  }
  func.func @transform_1(%arg0: i32) -> (i32, i32) {
    %c0_i32 = arith.constant 0 : i32
    %c0_i32_0 = arith.constant 0 : i32
    return %arg0, %c0_i32 : i32, i32
  }
  func.func @transform_2(%arg0: i32) -> (i32, i32, i32) {
    %c0_i32 = arith.constant 0 : i32
    %c0_i32_0 = arith.constant 0 : i32
    %c0_i32_1 = arith.constant 0 : i32
    %c0_i32_2 = arith.constant 0 : i32
    return %c0_i32, %c0_i32_0, %c0_i32_1 : i32, i32, i32
  }
  func.func @transform_3(%arg0: i32) -> (i32, i32) {
    %c0_i32 = arith.constant 0 : i32
    %c0_i32_0 = arith.constant 0 : i32
    %c0_i32_1 = arith.constant 0 : i32
    return %c0_i32, %c0_i32_0 : i32, i32
  }
  func.func @transform_4(%arg0: i32) -> (i32, i32, i32) {
    %c0_i32 = arith.constant 0 : i32
    %c0_i32_0 = arith.constant 0 : i32
    %c0_i32_1 = arith.constant 0 : i32
    return %arg0, %c0_i32, %c0_i32_0 : i32, i32, i32
  }
}

</mosaic_0001>

<bundles_post_ra>
// kernel: tpu_custom_call.1
= control target key start
LH: loop header
LB: loop body
LE: loop exit
PB: predicated region body
PF: predicated region fallthrough
CT: control target
= control target key end

     0   :  { %9 = vsyncpa [#allocation4], 0  ;;  %s954_s0 = inlined_call_operand.hbm [shape: f32[16,16], index: 0, kind: input, shape index: {}]   ;;  %s955_s1 = inlined_call_operand.hbm [shape: f32[16,16], index: 1, kind: input, shape index: {}]   ;;  %s956_s2 = inlined_call_operand.hbm [shape: f32[3,8,8], index: 2, kind: input, shape index: {}]   ;;  %s957_s3 = inlined_call_operand.vmem [shape: f32[8,1], index: 3, kind: input, shape index: {}]   ;;  %s958_s4 = inlined_call_operand.hbm [shape: f32[2,8,16], index: 4, kind: output, shape index: {}]  }
   0x1   :  { %10 = vsyncpa [#allocation7], 0 }
   0x2   :  { %12 = vsyncpa [#allocation7 + $0x1], 0 }
   0x3   :  { %13 = vsyncpa [#allocation5], 0 }
   0x4   :  { %15 = vsyncpa [#allocation5 + $0x1], 0  ;;  %s786_s15 = smov 0   ;;  %s788_s16 = smov 0  }
   0x5   :  { %s790_s17 = smov 0   ;;  %s792_s18 = smov 0  }
   0x6 LB: > { %s807_s19 = sadd.s32 4294967295, %s754_s18   ;;  %p499_p0 = scmp.ge.s32.totalorder %s754_s18, 1  ;;  %s754_s18 = sphi %s792_s18, %s969_s18   ;;  %s750_s17 = sphi %s790_s17, %s968_s17   ;;  %s746_s16 = sphi %s788_s16, %s967_s16   ;;  %s742_s15 = sphi %s786_s15, %s966_s15  }
   0x7   : > { %p63_p1 = scmp.eq.s32.totalorder %s807_s19, 0  ;;  %p128_p2 = scmp.eq.s32.totalorder %s807_s19, 1 }
   0x8   : > { %p141_p3 = scmp.lt.s32.totalorder %s754_s18, 3  ;;  %s166_s22 = sshll.u32 %s956_s2, 4  ;;  %s167_s22 = int_to_ptr.hbm [resolvable:$true] %s166_s22 }
   0x9   : > { %s756_s24 = smov [#allocation8]   ;;  %s152_s28 = sshll.u32 %s954_s0, 4  ;;  %s153_s28 = int_to_ptr.hbm [resolvable:$true] %s152_s28 }
   0xa   : > { %p816_p4 = pnand %p499_p0, %p141_p3  ;;  %s168_s25 = sshll.u32 %s756_s24, 4  ;;  %s169_s25 = int_to_ptr.vmem [resolvable:$true] %s168_s25 }
   0xb   : > { %s757_s29 = smov [#allocation3]   ;;  %s758_s5 = smov 128  }
   0xc   : > { %p531_p6 = pneg %p816_p4  ;;  %s154_s30 = sshll.u32 %s757_s29, 4  ;;  %s155_s30 = int_to_ptr.vmem [resolvable:$true] %s154_s30 }
   0xd   : > { %s759_s6 = smov 8   ;;  %s498_s7 = sadd.s32 4294967294, %s754_s18  }
   0xe   : > { %p532_p7 = pnand %p531_p6, %p63_p1  ;;  %s830_s8 = sadd.s32 1, %s754_s18  }
   0xf   : > { %s49_s9 = sadd.s32 1, %s750_s17  ;;  %s46_s10 = ssub.s32 %s754_s18, %s830_s8 }
  0x10   : > { %537 = dma.hbm_to_vmem [thread:$0]  (!%p532_p7), %s167_s22, 384, %s169_s25, [#allocation7], %s758_s5, %s758_s5, %s759_s6  }
  0x11   : > { %534 = dma.hbm_to_vmem [thread:$0]  (!%p532_p7), %s153_s28, 256, %s155_s30, [#allocation4], %s758_s5, %s758_s5, %s759_s6  }
  0x12   : > { %p56_p8 = scmp.ne.s32.totalorder %s750_s17, %s746_s16  ;;  %p47_p9 = scmp.eq.s32.totalorder %s46_s10, 0 }
  0x13   : > { %p57_p10 = scmp.eq.s32.totalorder %s754_s18, 0  ;;  %p62_p11 = scmp.ne.s32.totalorder %s746_s16, %s742_s15 }
  0x14   : > { %p842_p12 = por %p128_p2, %p56_p8  ;;  %p134_p3 = scmp.eq.s32.totalorder %s498_s7, 1 }
  0x15   : > { %s847_s12 = scalar_select %p47_p9, %s750_s17, %s49_s9  }
  0x16   : > { %p851_p13 = por %p63_p1, %p62_p11  ;;  %p855_p0 = por %p57_p10, %p56_p8 }
  0x17   : > { %p548_p6 = scmp.lt.s32.totalorder %s754_s18, 2  ;;  %s187_s20 = sand.u32 1, %s750_s17  }
  0x18   : > { %p861_p7 = por %p134_p3, %p62_p11  ;;  %s185_s22 = sand.u32 1, %s754_s18  }
  0x19   : > { %s503_s24 = sshll.u32 %s187_s20, 3  ;;  %s504_s25 = sshll.u32 %s754_s18, 3 }
  0x1a   : > { %s193_s28 = scalar_lea.hbm %s955_s1, %s504_s25  ;;  %s189_s30 = scalar_lea.vmem [#allocation6], %s503_s24 }
  0x1b   : > { %s195_s29 = sshll.u32 %s193_s28, 4  ;;  %s197_s5 = sshll.u32 %s189_s30, 4  ;;  %s196_s29 = int_to_ptr.hbm [resolvable:$true] %s195_s29  ;;  %s198_s5 = int_to_ptr.vmem [resolvable:$true] %s197_s5 }
  0x1c   : > { %p872_p2 = pnand %p548_p6, %p855_p0  ;;  %s186_s7 = scalar_lea.sflag [#allocation7], %s185_s22 }
  0x1d   : > { %s650_s9 = sshra.s32 %s196_s29, 4  ;;  %s657_s25 = scalar_lea.hbm %s955_s1, 16  ;;  %s651_s9 = int_to_ptr.hbm [resolvable:$true] %s650_s9 }
  0x1e   : > { %s652_s10 = scalar_lea.hbm %s651_s9, 8  ;;  %p654_p9 = pneg %p872_p2 }
  0x1f   : > { %p653_p8 = scmp.ne.s32.totalorder %s651_s9, %s652_s10  ;;  %p658_p0 = scmp.lt.s32.totalorder %s651_s9, %s955_s1 }
  0x20   : > { %p659_p3 = scmp.lt.s32.totalorder %s657_s25, %s652_s10 }
  0x21   : > { %p655_p10 = pnand %p654_p9, %p653_p8 }
  0x22   : > { %p660_p6 = por %p659_p3, %p658_p0 }
  0x23   : > { %p656_p11 = pneg %p655_p10 }
  0x25   : > { %p661_p5 = pnand %p660_p6, %p656_p11 }
  0x27   : > { %664 = shalt.err (!%p661_p5)
}
  0x28   : > { %541 = dma.hbm_to_vmem [thread:$0]  (!%p872_p2), %s196_s29, 128, %s198_s5, %s186_s7  }
  0x29   : > { %206 = sbr.rel (%p816_p4) target bundleno = 461 (0x1cd), region = 36 }
  0x2e   : > { %725 = dma.done.wait (%p63_p1), [#allocation4], 256  }
  0x2f   : > { %727 = vsyncadd (%p63_p1), [#allocation4], 4294967040  ;;  %s213_s22 = sand.u32 1, %s807_s19   ;;  %s215_s27 = sand.u32 1, %s746_s16  }
  0x30   : > { %s896_s28 = sshll.u32 %s215_s27, 3  ;;  %s214_s29 = scalar_lea.sflag [#allocation7], %s213_s22 }
  0x31   : > { %s217_s30 = scalar_lea.vmem [#allocation6], %s896_s28 }
  0x32   : > { %729 = dma.done.wait (%p851_p13), %s214_s29, 128  }
  0x33   : > { %731 = vsyncadd (%p851_p13), %s214_s29, 4294967168 }
  0x34   : > { %733 = dma.done.wait (%p63_p1), [#allocation7], 384  }
  0x35   : > { %735 = vsyncadd (%p63_p1), [#allocation7], 4294966912  ;;  %v249_v0 = vld [vmem:[#allocation3 + $0x8] sm:$0xff]  ;;  %v248_v1 = vld [vmem:[#allocation3] sm:$0xff]  ;;  %vm276_vm0 = vcmask 130048   ;;  %vm252_vm1 = vcmask 64512  }
  0x36   : > { %295 = vmatpush.msra.mxu1 %v249_v0  ;;  %v250_v2 = vld [vmem:[%s217_s30] sm:$0xff]  ;;  %346 = vmatpush.msra.mxu3 %v249_v0  ;;  %v251_v3 = vld [vmem:[#allocation8] sm:$0xff]  ;;  %v302_v4 = vld [vmem:[#allocation8 + $0x8] sm:$0xff]  ;;  %v760_v8 = vmov 0   ;;  %s516_s5 = sshll.u32 %s807_s19, 3  ;;  %s247_s10 = scalar_lea.vmem [#allocation9], %s896_s28 }
  0x37   : > { %271 = vmatpush.msra.mxu0 %v250_v2  ;;  %v383_v6 = vld [vmem:[%s957_s3] sm:$0xff]  ;;  %589 = vset.pattern.permute.xlu0 %v760_v8  ;;  %v355_v15 = vld [vmem:[#allocation8 + $0x10] sm:$0xff]  ;;  %s402_s9 = scalar_lea.hbm %s958_s4, %s516_s5  ;;  %s404_s20 = sshll.u32 %s247_s10, 4  ;;  %s405_s20 = int_to_ptr.vmem [resolvable:$true] %s404_s20 }
  0x38   : > { %296 = vmatpush.msra.mxu1 %v248_v1  ;;  %347 = vmatpush.msra.mxu3 %v248_v1  ;;  %s406_s24 = sshll.u32 %s402_s9, 4  ;;  %s392_s25 = scalar_lea.sflag [#allocation5], %s215_s27  ;;  %s407_s24 = int_to_ptr.hbm [resolvable:$true] %s406_s24 }
  0x39   : > { %511 = vmatmul.msk.f32.vlgmr.msra.gmra.mxu1 %vm276_vm0, %v250_v2  ;;  %510 = vmatmul.msk.f32.vlgmr.msra.gmra.mxu0 %vm252_vm1, %v251_v3  ;;  %s694_s19 = sshra.s32 %s407_s24, 4  ;;  %s700_s28 = scalar_lea.hbm %s958_s4, 16  ;;  %s695_s19 = int_to_ptr.hbm [resolvable:$true] %s694_s19 }
  0x3a   : > { %386 = vperm.xlu0 %589, %v383_v6   ;;  %s696_s26 = scalar_lea.hbm %s695_s19, 8  ;;  %p701_p13 = scmp.lt.s32.totalorder %s695_s19, %s958_s4 }
  0x3b   : > { %p697_p1 = scmp.ne.s32.totalorder %s695_s19, %s696_s26  ;;  %p702_p2 = scmp.lt.s32.totalorder %s700_s28, %s696_s26 }
  0x3d   : > { %p698_p4 = pnand %p697_p1, %p842_p12  ;;  %p703_p8 = por %p702_p2, %p701_p13 }
  0x3f   : > { %p699_p5 = pneg %p698_p4 }
  0x41   : > { %p704_p9 = pnand %p703_p8, %p699_p5 }
  0xac   : > { %v387_v19 = vpop.permute.xlu0 %386 }
  0xb6   : > { %v298_v5 = vpop.f32.mrf.mxu1  ;;  %v273_v7 = vpop.f32.mrf.mxu0 }
  0xb7   : > { %321 = vmatpush.msra.mxu2 %v298_v5  ;;  %513 = vmatmul.msk.f32.vlgmr.msra.gmra.mxu3 %vm276_vm0, %v298_v5  ;;  %277 = vst.msk [vmem:[#allocation2] sm:$0xff] %vm276_vm0, %v273_v7 }
  0xb8   : > { %512 = vmatmul.msk.f32.vlgmr.msra.gmra.mxu2 %vm252_vm1, %v302_v4 }
  0xbe   : > { %v326_v9 = vld [vmem:[#allocation2] sm:$0xff] }
 0x13a   : > { %v349_v10 = vpop.f32.mrf.mxu3 }
 0x13b   : > { %v352_v11 = vmul.f32 2.0, %v349_v10  ;;  %v323_v12 = vpop.f32.mrf.mxu2 }
 0x13c   : > { %v327_v13 = vadd.f32 %v326_v9, %v323_v12 }
 0x13d   : > { %v353_v14 = vsub.f32 %v352_v11, %v250_v2 }
 0x13e   : > { %328 = vst.msk [vmem:[#allocation2] sm:$0xff] %vm276_vm0, %v327_v13 }
 0x13f   : > { %374 = vmatpush.msrb.mxu0 %v353_v14 }
 0x140   : > { %514 = vmatmul.msk.f32.vlgmr.msrb.gmra.mxu0 %vm252_vm1, %v355_v15 }
 0x145   : > { %v379_v16 = vld [vmem:[#allocation2] sm:$0xff] }
 0x1bd   : > { %v376_v17 = vpop.f32.mrf.mxu0 }
 0x1be   : > { %v380_v18 = vadd.f32 %v379_v16, %v376_v17 }
 0x1c0   : > { %381 = vst.msk [vmem:[#allocation2] sm:$0xff] %vm276_vm0, %v380_v18 }
 0x1c7   : > { %v382_v20 = vld [vmem:[#allocation2] sm:$0xff] }
 0x1c8   : > { %v389_v21 = vadd.f32 %v387_v19, %v382_v20 }
 0x1ca   : > { %390 = vst.msk [vmem:[%s247_s10] sm:$0xff] %vm276_vm0, %v389_v21 }
 0x1cb   : > { %707 = shalt.err (!%p704_p9)
}
 0x1cc   : > { %529 = dma.vmem_to_hbm [thread:$0]  (%p842_p12), %s405_s20, 128, %s407_s24, %s392_s25  }
 0x1cd PF: > { %s418_s27 = sand.u32 1, %s742_s15   ;;  %p965_p10 = scmp.ge.s32.totalorder %s754_s18, 2 }
 0x1ce   : > { %s419_s23 = scalar_lea.sflag [#allocation5], %s418_s27 }
 0x1cf   : > { %p543_p11 = pnand %p965_p10, %p861_p7 }
 0x1d1   : > { %p544_p0 = pneg %p543_p11 }
 0x1d3   : > { %737 = dma.done.wait (%p544_p0), %s419_s23, 128  }
 0x1d4   : > { %739 = vsyncadd (%p544_p0), %s419_s23, 4294967168  ;;  %p18_p3 = scmp.ge.s32.totalorder %s830_s8, 4   ;;  %s966_s15 = smov %s746_s16 }
 0x1d5   : > { %s967_s16 = smov %s750_s17  ;;  %s968_s17 = smov %s847_s12 }
 0x1d6   : > { %s969_s18 = smov %s830_s8  ;;  %20 = sbr.rel (!%p18_p3) target bundleno = 6 (0x6), region = 92 }
 0x1db   :  { %425 = vsyncpa [#allocation4], 1 }
 0x1dc   :  { %427 = vsyncpa [#allocation4 + $0x1], 1 }
 0x1dd   :  { %428 = vsyncpa [#allocation7], 1 }
 0x1de   :  { %430 = vsyncpa [#allocation7 + $0x1], 1 }
 0x1df   :  { %431 = vsyncpa [#allocation5], 1 }
 0x1e0   :  { %433 = vsyncpa [#allocation5 + $0x1], 1 }

</bundles_post_ra>
